<compile_context>
chip_gen: v6e
topology: v6e:2x2x1
jax: 0.10.0
libtpu: 0.0.40
codegen_flags: <defaults>
</compile_context>

<pallas_src>
import jax
import jax.numpy as jnp
from jax.experimental import pallas as pl
from jax.experimental.pallas import tpu as pltpu


def _round_up(x, m):
    return (x + m - 1) // m * m


def _make_mulcls_kernel(n_actual, tile_n):
    """Build the kernel with the true batch size and lane-tile baked in."""

    def kernel(f_ref, p_ref, lbl_ref, f_out, p_out, acc_ref):
        pid = pl.program_id(0)

        @pl.when(pid == 0)
        def _init():
            acc_ref[0] = jnp.float32(0.0)
            acc_ref[1] = jnp.float32(0.0)

        labels = lbl_ref[...]                                       # (1, tn) int32

        # Validity mask for batch-padding columns (padded cols contribute 0).
        col = pid * tile_n + jax.lax.broadcasted_iota(
            jnp.int32, (1, tile_n), 1)
        valid = (col < n_actual).astype(jnp.float32)                # (1, tn)

        cf = f_ref.shape[0]
        cp = p_ref.shape[0]

        # One-hot mask along the (sublane) class axis; built once and shared
        # across both heads when their class counts match.
        onehot_f = jax.lax.broadcasted_iota(jnp.int32, (cf, tile_n), 0) == labels
        if cp == cf:
            onehot_p = onehot_f
        else:
            onehot_p = (jax.lax.broadcasted_iota(jnp.int32, (cp, tile_n), 0)
                        == labels)

        def ce_partial_sum(x, onehot):
            # x: (C, tn) logits for this batch tile; classes on sublane axis.
            x = x.astype(jnp.float32)
            m = jnp.max(x, axis=0, keepdims=True)                   # (1, tn)
            lse = m + jnp.log(jnp.sum(jnp.exp(x - m),
                                      axis=0, keepdims=True))       # (1, tn)
            picked = jnp.sum(jnp.where(onehot, x, 0.0),
                             axis=0, keepdims=True)                 # (1, tn)
            return jnp.sum((lse - picked) * valid)                  # scalar

        acc_ref[0] += ce_partial_sum(f_ref[...], onehot_f)
        acc_ref[1] += ce_partial_sum(p_ref[...], onehot_p)

        @pl.when(pid == pl.num_programs(0) - 1)
        def _finalize():
            inv_n = jnp.float32(1.0 / n_actual)
            f_out[0, 0] = acc_ref[0] * inv_n
            p_out[0, 0] = acc_ref[1] * inv_n

    return kernel


def mobilenet_mulcls_loss(net_output, ground_truth, *, tile_n=512):
    """Pallas TPU implementation of mobilenet_mulcls_loss.forward.

    net_output:   dict with 'foreign' (N, Cf) and 'position' (N, Cp) logits.
    ground_truth: dict with 'foreign_labels' (N,) integer labels.
    Returns (total_loss, {'foreign': foreign_loss, 'position': position_loss}).
    """
    foreign = net_output["foreign"]
    position = net_output["position"]
    labels = ground_truth["foreign_labels"].astype(jnp.int32)

    n, cf = foreign.shape
    cp = position.shape[1]
    assert position.shape[0] == n and labels.shape[0] == n

    # Lane-axis tile over the batch: multiple of 128, default 512 rows.
    tn = _round_up(min(tile_n, _round_up(n, 128)), 128)
    n_pad = _round_up(n, tn)
    pad = n_pad - n

    # Layout plumbing: batch -> lane axis (last), classes -> sublane axis.
    f_t = jnp.pad(foreign.T, ((0, 0), (0, pad)))                 # (Cf, n_pad)
    p_t = jnp.pad(position.T, ((0, 0), (0, pad)))                # (Cp, n_pad)
    lbl = jnp.pad(labels.reshape(1, n), ((0, 0), (0, pad)))      # (1, n_pad)

    # Explicit scoped-VMEM limit: (2 heads + labels) x double buffering,
    # with generous headroom, capped well under v7x's 64 MiB physical VMEM.
    tile_bytes = (cf + cp) * tn * 4 + tn * 4
    vmem_limit = int(min(48 * 1024 * 1024, max(4 * 1024 * 1024, 8 * tile_bytes)))

    kernel = _make_mulcls_kernel(n, tn)

    f_out, p_out = pl.pallas_call(
        kernel,
        out_shape=(
            jax.ShapeDtypeStruct((1, 1), jnp.float32),   # foreign loss
            jax.ShapeDtypeStruct((1, 1), jnp.float32),   # position loss
        ),
        grid_spec=pltpu.PrefetchScalarGridSpec(
            num_scalar_prefetch=0,
            grid=(n_pad // tn,),
            in_specs=[
                pl.BlockSpec((cf, tn), lambda i: (0, i)),   # foreign  (C, N) tile
                pl.BlockSpec((cp, tn), lambda i: (0, i)),   # position (C, N) tile
                pl.BlockSpec((1, tn), lambda i: (0, i)),    # labels   (1, N) tile
            ],
            out_specs=(
                pl.BlockSpec((1, 1), lambda i: (0, 0), memory_space=pltpu.SMEM),
                pl.BlockSpec((1, 1), lambda i: (0, 0), memory_space=pltpu.SMEM),
            ),
            scratch_shapes=[pltpu.SMEM((2,), jnp.float32)],  # running sums
        ),
        compiler_params=pltpu.CompilerParams(
            dimension_semantics=("arbitrary",),
            vmem_limit_bytes=vmem_limit,
        ),
    )(f_t, p_t, lbl)

    foreign_loss = f_out[0, 0]
    position_loss = p_out[0, 0]
    loss = foreign_loss + position_loss
    return loss, {"foreign": foreign_loss, "position": position_loss}


def _reference(net_output, ground_truth):
    """Pure-JAX reference mirroring F.cross_entropy (mean reduction)."""
    labels = ground_truth["foreign_labels"].astype(jnp.int32)

    def ce(x):
        x = x.astype(jnp.float32)
        logp = jax.nn.log_softmax(x, axis=-1)
        return -jnp.mean(jnp.take_along_axis(logp, labels[:, None], axis=-1))

    f = ce(net_output["foreign"])
    p = ce(net_output["position"])
    return f + p, {"foreign": f, "position": p}


if __name__ == "__main__":
    key = jax.random.PRNGKey(0)
    k_f, k_p, k_l = jax.random.split(key, 3)

    N = 8            # batch
    C_FOREIGN = 8    # classes for 'foreign' head
    C_POSITION = 8   # classes for 'position' head (same labels used)

    net_output = {
        "foreign": jax.random.normal(k_f, (N, C_FOREIGN), dtype=jnp.float32),
        "position": jax.random.normal(k_p, (N, C_POSITION), dtype=jnp.float32),
    }
    ground_truth = {
        "foreign_labels": jax.random.randint(
            k_l, (N,), 0, min(C_FOREIGN, C_POSITION), dtype=jnp.int32),
    }

    loss, parts = mobilenet_mulcls_loss(net_output, ground_truth)
    loss = jax.block_until_ready(loss)
    parts = jax.tree_util.tree_map(jax.block_until_ready, parts)

    ref_loss, ref_parts = _reference(net_output, ground_truth)
    assert jnp.allclose(loss, ref_loss, atol=1e-5), (loss, ref_loss)
    assert jnp.allclose(parts["foreign"], ref_parts["foreign"], atol=1e-5)
    assert jnp.allclose(parts["position"], ref_parts["position"], atol=1e-5)

    print("KERNEL_OK")
</pallas_src>

<mosaic_0001>
module attributes {stable_mosaic.version = 11 : i64} {
  func.func @kernel(%arg0: i32, %arg1: memref<8x128xf32, #tpu.memory_space<vmem>>, %arg2: memref<8x128xf32, #tpu.memory_space<vmem>>, %arg3: memref<1x128xi32, #tpu.memory_space<vmem>>, %arg4: memref<1x1xf32, #tpu.memory_space<smem>>, %arg5: memref<1x1xf32, #tpu.memory_space<smem>>, %arg6: memref<2xf32, #tpu.memory_space<smem>>) attributes {dimension_semantics = [#tpu.dimension_semantics<arbitrary>], iteration_bounds = array<i64: 1>, scalar_prefetch = 0 : i64, scratch_operands = 1 : i64, tpu.core_type = #tpu.core_type<tc>, window_params = [{transform_indices = @transform_0, window_bounds = array<i64: 8, 128>}, {transform_indices = @transform_1, window_bounds = array<i64: 8, 128>}, {transform_indices = @transform_2, window_bounds = array<i64: 1, 128>}, {transform_indices = @transform_3, window_bounds = array<i64: 1, 1>}, {transform_indices = @transform_4, window_bounds = array<i64: 1, 1>}]} {
    %c0_i32 = arith.constant 0 : i32
    %0 = arith.cmpi eq, %arg0, %c0_i32 : i32
    %1 = arith.extui %0 : i1 to i32
    %c0_i32_0 = arith.constant 0 : i32
    %2 = arith.cmpi ne, %1, %c0_i32_0 : i32
    scf.if %2 {
      %cst_20 = arith.constant 0.000000e+00 : f32
      %c0_21 = arith.constant 0 : index
      %64 = memref.load %arg6[%c0_21] : memref<2xf32, #tpu.memory_space<smem>>
      memref.store %cst_20, %arg6[%c0_21] : memref<2xf32, #tpu.memory_space<smem>>
      %cst_22 = arith.constant 0.000000e+00 : f32
      %c1_23 = arith.constant 1 : index
      %65 = memref.load %arg6[%c1_23] : memref<2xf32, #tpu.memory_space<smem>>
      memref.store %cst_22, %arg6[%c1_23] : memref<2xf32, #tpu.memory_space<smem>>
    } else {
    }
    %c0 = arith.constant 0 : index
    %c0_1 = arith.constant 0 : index
    %3 = vector.load %arg3[%c0, %c0_1] : memref<1x128xi32, #tpu.memory_space<vmem>>, vector<1x128xi32>
    %c128_i32 = arith.constant 128 : i32
    %4 = arith.muli %arg0, %c128_i32 : i32
    %5 = tpu.iota {dimensions = array<i32: 1>} : vector<1x128xi32>
    %6 = vector.broadcast %4 : i32 to vector<1x128xi32>
    %7 = arith.addi %6, %5 : vector<1x128xi32>
    %c8_i32 = arith.constant 8 : i32
    %8 = vector.broadcast %c8_i32 : i32 to vector<1x128xi32>
    %9 = arith.cmpi slt, %7, %8 : vector<1x128xi32>
    %10 = arith.extui %9 : vector<1x128xi1> to vector<1x128xi32>
    %11 = arith.sitofp %10 : vector<1x128xi32> to vector<1x128xf32>
    %12 = tpu.iota {dimensions = array<i32: 0>} : vector<8x128xi32>
    %13 = vector.broadcast %3 : vector<1x128xi32> to vector<8x128xi32>
    %14 = arith.cmpi eq, %12, %13 : vector<8x128xi32>
    %c0_2 = arith.constant 0 : index
    %15 = memref.load %arg6[%c0_2] : memref<2xf32, #tpu.memory_space<smem>>
    %c0_3 = arith.constant 0 : index
    %c0_4 = arith.constant 0 : index
    %16 = vector.load %arg1[%c0_3, %c0_4] : memref<8x128xf32, #tpu.memory_space<vmem>>, vector<8x128xf32>
    %cst = arith.constant dense<0xFF800000> : vector<128xf32>
    %17 = vector.multi_reduction <maximumf>, %16, %cst [0] : vector<8x128xf32> to vector<128xf32>
    %18 = vector.shape_cast %17 : vector<128xf32> to vector<1x128xf32>
    %19 = vector.broadcast %18 : vector<1x128xf32> to vector<8x128xf32>
    %20 = arith.subf %16, %19 : vector<8x128xf32>
    %21 = math.exp %20 : vector<8x128xf32>
    %cst_5 = arith.constant dense<0.000000e+00> : vector<128xf32>
    %22 = vector.multi_reduction <add>, %21, %cst_5 [0] : vector<8x128xf32> to vector<128xf32>
    %23 = vector.shape_cast %22 : vector<128xf32> to vector<1x128xf32>
    %24 = math.log %23 : vector<1x128xf32>
    %25 = arith.addf %18, %24 : vector<1x128xf32>
    %cst_6 = arith.constant 0.000000e+00 : f32
    %26 = vector.broadcast %cst_6 : f32 to vector<8x128xf32>
    %27 = arith.select %14, %16, %26 : vector<8x128xi1>, vector<8x128xf32>
    %cst_7 = arith.constant dense<0.000000e+00> : vector<128xf32>
    %28 = vector.multi_reduction <add>, %27, %cst_7 [0] : vector<8x128xf32> to vector<128xf32>
    %29 = vector.shape_cast %28 : vector<128xf32> to vector<1x128xf32>
    %30 = arith.subf %25, %29 : vector<1x128xf32>
    %31 = arith.mulf %30, %11 : vector<1x128xf32>
    %32 = vector.shape_cast %31 : vector<1x128xf32> to vector<1x1x128xf32>
    %cst_8 = arith.constant dense<0.000000e+00> : vector<1xf32>
    %33 = vector.multi_reduction <add>, %32, %cst_8 [1, 2] : vector<1x1x128xf32> to vector<1xf32>
    %34 = vector.shape_cast %33 : vector<1xf32> to vector<1x1x1xf32>
    %35 = vector.extract %34[0, 0, 0] : f32 from vector<1x1x1xf32>
    %36 = arith.addf %15, %35 : f32
    %c0_9 = arith.constant 0 : index
    %37 = memref.load %arg6[%c0_9] : memref<2xf32, #tpu.memory_space<smem>>
    memref.store %36, %arg6[%c0_9] : memref<2xf32, #tpu.memory_space<smem>>
    %c1 = arith.constant 1 : index
    %38 = memref.load %arg6[%c1] : memref<2xf32, #tpu.memory_space<smem>>
    %c0_10 = arith.constant 0 : index
    %c0_11 = arith.constant 0 : index
    %39 = vector.load %arg2[%c0_10, %c0_11] : memref<8x128xf32, #tpu.memory_space<vmem>>, vector<8x128xf32>
    %cst_12 = arith.constant dense<0xFF800000> : vector<128xf32>
    %40 = vector.multi_reduction <maximumf>, %39, %cst_12 [0] : vector<8x128xf32> to vector<128xf32>
    %41 = vector.shape_cast %40 : vector<128xf32> to vector<1x128xf32>
    %42 = vector.broadcast %41 : vector<1x128xf32> to vector<8x128xf32>
    %43 = arith.subf %39, %42 : vector<8x128xf32>
    %44 = math.exp %43 : vector<8x128xf32>
    %cst_13 = arith.constant dense<0.000000e+00> : vector<128xf32>
    %45 = vector.multi_reduction <add>, %44, %cst_13 [0] : vector<8x128xf32> to vector<128xf32>
    %46 = vector.shape_cast %45 : vector<128xf32> to vector<1x128xf32>
    %47 = math.log %46 : vector<1x128xf32>
    %48 = arith.addf %41, %47 : vector<1x128xf32>
    %cst_14 = arith.constant 0.000000e+00 : f32
    %49 = vector.broadcast %cst_14 : f32 to vector<8x128xf32>
    %50 = arith.select %14, %39, %49 : vector<8x128xi1>, vector<8x128xf32>
    %cst_15 = arith.constant dense<0.000000e+00> : vector<128xf32>
    %51 = vector.multi_reduction <add>, %50, %cst_15 [0] : vector<8x128xf32> to vector<128xf32>
    %52 = vector.shape_cast %51 : vector<128xf32> to vector<1x128xf32>
    %53 = arith.subf %48, %52 : vector<1x128xf32>
    %54 = arith.mulf %53, %11 : vector<1x128xf32>
    %55 = vector.shape_cast %54 : vector<1x128xf32> to vector<1x1x128xf32>
    %cst_16 = arith.constant dense<0.000000e+00> : vector<1xf32>
    %56 = vector.multi_reduction <add>, %55, %cst_16 [1, 2] : vector<1x1x128xf32> to vector<1xf32>
    %57 = vector.shape_cast %56 : vector<1xf32> to vector<1x1x1xf32>
    %58 = vector.extract %57[0, 0, 0] : f32 from vector<1x1x1xf32>
    %59 = arith.addf %38, %58 : f32
    %c1_17 = arith.constant 1 : index
    %60 = memref.load %arg6[%c1_17] : memref<2xf32, #tpu.memory_space<smem>>
    memref.store %59, %arg6[%c1_17] : memref<2xf32, #tpu.memory_space<smem>>
    %c0_i32_18 = arith.constant 0 : i32
    %61 = arith.cmpi eq, %arg0, %c0_i32_18 : i32
    %62 = arith.extui %61 : i1 to i32
    %c0_i32_19 = arith.constant 0 : i32
    %63 = arith.cmpi ne, %62, %c0_i32_19 : i32
    scf.if %63 {
      %c0_20 = arith.constant 0 : index
      %64 = memref.load %arg6[%c0_20] : memref<2xf32, #tpu.memory_space<smem>>
      %cst_21 = arith.constant 1.250000e-01 : f32
      %65 = arith.mulf %64, %cst_21 : f32
      %c0_22 = arith.constant 0 : index
      %c0_23 = arith.constant 0 : index
      %66 = memref.load %arg4[%c0_22, %c0_23] : memref<1x1xf32, #tpu.memory_space<smem>>
      memref.store %65, %arg4[%c0_22, %c0_23] : memref<1x1xf32, #tpu.memory_space<smem>>
      %c1_24 = arith.constant 1 : index
      %67 = memref.load %arg6[%c1_24] : memref<2xf32, #tpu.memory_space<smem>>
      %cst_25 = arith.constant 1.250000e-01 : f32
      %68 = arith.mulf %67, %cst_25 : f32
      %c0_26 = arith.constant 0 : index
      %c0_27 = arith.constant 0 : index
      %69 = memref.load %arg5[%c0_26, %c0_27] : memref<1x1xf32, #tpu.memory_space<smem>>
      memref.store %68, %arg5[%c0_26, %c0_27] : memref<1x1xf32, #tpu.memory_space<smem>>
    } else {
    }
    return
  }
  func.func @transform_0(%arg0: i32) -> (i32, i32) {
    %c0_i32 = arith.constant 0 : i32
    %c0_i32_0 = arith.constant 0 : i32
    return %c0_i32, %arg0 : i32, i32
  }
  func.func @transform_1(%arg0: i32) -> (i32, i32) {
    %c0_i32 = arith.constant 0 : i32
    %c0_i32_0 = arith.constant 0 : i32
    return %c0_i32, %arg0 : i32, i32
  }
  func.func @transform_2(%arg0: i32) -> (i32, i32) {
    %c0_i32 = arith.constant 0 : i32
    %c0_i32_0 = arith.constant 0 : i32
    return %c0_i32, %arg0 : i32, i32
  }
  func.func @transform_3(%arg0: i32) -> (i32, i32) {
    %c0_i32 = arith.constant 0 : i32
    %c0_i32_0 = arith.constant 0 : i32
    %c0_i32_1 = arith.constant 0 : i32
    return %c0_i32, %c0_i32_0 : i32, i32
  }
  func.func @transform_4(%arg0: i32) -> (i32, i32) {
    %c0_i32 = arith.constant 0 : i32
    %c0_i32_0 = arith.constant 0 : i32
    %c0_i32_1 = arith.constant 0 : i32
    return %c0_i32, %c0_i32_0 : i32, i32
  }
}

</mosaic_0001>

<bundles_post_ra>
// kernel: tpu_custom_call.1
= control target key start
LH: loop header
LB: loop body
LE: loop exit
PB: predicated region body
PF: predicated region fallthrough
CT: control target
= control target key end

     0   :  { %10 = vsyncpa [#allocation4], 0  ;;  %s319_s0 = inlined_call_operand.hbm [shape: f32[8,128], index: 0, kind: input, shape index: {}]   ;;  %s320_s1 = inlined_call_operand.hbm [shape: f32[8,128], index: 1, kind: input, shape index: {}]   ;;  %s321_s2 = inlined_call_operand.vmem [shape: s32[1,128], index: 2, kind: input, shape index: {}]   ;;  %s322_s3 = inlined_call_operand.hbm [shape: f32[1,1], index: 3, kind: output, shape index: {0}]   ;;  %s323_s4 = inlined_call_operand.hbm [shape: f32[1,1], index: 4, kind: output, shape index: {1}]  }
   0x1   :  { %11 = vsyncpa [#allocation7], 0 }
   0x2   :  { %12 = vsyncpa [#allocation5], 0 }
   0x3   :  { %13 = vsyncpa [#allocation10], 0  ;;  %s274_s15 = smov [#allocation3]   ;;  %s275_s17 = smov [#allocation6]  }
   0x4   :  { %s20_s16 = sshll.u32 %s274_s15, 4  ;;  %s30_s18 = sshll.u32 %s275_s17, 4  ;;  %s21_s16 = int_to_ptr.vmem [resolvable:$true] %s20_s16  ;;  %s31_s18 = int_to_ptr.vmem [resolvable:$true] %s30_s18 }
   0x5   :  { %s218_s19 = scalar_lea.vmem %s21_s16, 128  ;;  %p223_p1 = scmp.lt.s32.totalorder %s21_s16, %s21_s16 }
   0x6   :  { %p219_p0 = scmp.ne.s32.totalorder %s21_s16, %s218_s19  ;;  %p224_p2 = scmp.lt.s32.totalorder %s218_s19, %s218_s19 }
   0x8   :  { %p225_p3 = por %p224_p2, %p223_p1 }
   0xa   :  { %p226_p4 = pnand %p225_p3, %p219_p0 }
   0xc   :  { %229 = shalt.err (!%p226_p4)
}
   0xd   :  { %23 = dma.hbm_to_vmem [thread:$0]  %s319_s0, 128, %s21_s16, [#allocation4]  }
   0xe   :  { %s238_s22 = scalar_lea.vmem %s31_s18, 128  ;;  %p243_p6 = scmp.lt.s32.totalorder %s31_s18, %s31_s18 }
   0xf   :  { %p239_p5 = scmp.ne.s32.totalorder %s31_s18, %s238_s22  ;;  %p244_p7 = scmp.lt.s32.totalorder %s238_s22, %s238_s22 }
  0x11   :  { %p245_p8 = por %p244_p7, %p243_p6 }
  0x13   :  { %p246_p9 = pnand %p245_p8, %p239_p5 }
  0x15   :  { %249 = shalt.err (!%p246_p9)
}
  0x16   :  { %33 = dma.hbm_to_vmem [thread:$0]  %s320_s1, 128, %s31_s18, [#allocation7]  }
  0x17   :  { %266 = dma.done.wait [#allocation4], 128  }
  0x18   :  { %267 = vsyncadd [#allocation4], 4294967168 }
  0x19   :  { %268 = dma.done.wait [#allocation7], 128  }
  0x1a   :  { %269 = vsyncadd [#allocation7], 4294967168  ;;  %v67_v0 = vld [vmem:[#allocation3] sm:$0xff]  ;;  %v110_v1 = vld [vmem:[#allocation6] sm:$0xff]  ;;  %v52_v18 = vlaneseq  ;;  %v276_v55 = vmov 0.0   ;;  %vm95_vm2 = vcmask 1040384  }
  0x1b   :  { %v68_v2 = vrot.slane %v67_v0, 4  ;;  %v111_v3 = vrot.slane %v110_v1, 4  ;;  %v190_v20 = vld [vmem:[%s321_s2] ss:$0 sm:$0xff]  ;;  %s277_s28 = smov [#allocation8]   ;;  %s278_s5 = smov [#allocation9]  }
  0x1c   :  { %v60_v19 = vshrl.u32 %v52_v18, 7  ;;  %v53_v45 = vand.u32 127, %v52_v18 }
  0x1d   :  { %v69_v4 = vmax.f32 %v67_v0, %v68_v2  ;;  %v112_v5 = vmax.f32 %v110_v1, %v111_v3 }
  0x1e   :  { %vm65_vm0 = vcmp.eq.s32.totalorder %v60_v19, %v190_v20  ;;  %vm56_vm1 = vcmp.lt.s32.totalorder %v53_v45, 8 }
  0x1f   :  { %v70_v6 = vrot.slane %v69_v4, 2  ;;  %v113_v7 = vrot.slane %v112_v5, 2  ;;  %v86_v26 = vsel %vm65_vm0, %v67_v0, 0.0  ;;  %v129_v29 = vsel %vm65_vm0, %v110_v1, 0.0 }
  0x20   :  { %v87_v32 = vrot.slane %v86_v26, 4  ;;  %v130_v33 = vrot.slane %v129_v29, 4  ;;  %v189_v56 = vsel %vm56_vm1, 1.0, %v276_v55 }
  0x21   :  { %v71_v8 = vmax.f32 %v69_v4, %v70_v6  ;;  %v114_v9 = vmax.f32 %v112_v5, %v113_v7 }
  0x22   :  { %v88_v38 = vadd.f32 %v87_v32, %v86_v26  ;;  %v131_v40 = vadd.f32 %v130_v33, %v129_v29 }
  0x23   :  { %v72_v10 = vrot.slane %v71_v8, 1  ;;  %v115_v11 = vrot.slane %v114_v9, 1 }
  0x24   :  { %v89_v41 = vrot.slane %v88_v38, 2  ;;  %v132_v42 = vrot.slane %v131_v40, 2 }
  0x25   :  { %v73_v12 = vmax.f32 %v71_v8, %v72_v10  ;;  %v116_v13 = vmax.f32 %v114_v9, %v115_v11 }
  0x26   :  { %v90_v43 = vadd.f32 %v89_v41, %v88_v38  ;;  %v133_v44 = vadd.f32 %v132_v42, %v131_v40 }
  0x27   :  { %v74_v14 = vsub.f32 %v67_v0, %v73_v12  ;;  %v117_v15 = vsub.f32 %v110_v1, %v116_v13 }
  0x28   :  { %v91_v46 = vrot.slane %v90_v43, 1  ;;  %v134_v47 = vrot.slane %v133_v44, 1 }
  0x29   :  { %v75_v16 = vmul.f32 1.442695, %v74_v14  ;;  %v118_v17 = vmul.f32 1.442695, %v117_v15 }
  0x2a   :  { %v92_v51 = vadd.f32 %v91_v46, %v90_v43  ;;  %v135_v53 = vadd.f32 %v134_v47, %v133_v44 }
  0x2b   :  { %202 = vpow2.f32 %v75_v16 }
  0x2c   :  { %204 = vpow2.f32 %v118_v17 }
  0x38   :  { %v203_v21 = vpop.eup %202 }
  0x39   :  { %v205_v22 = vpop.eup %204  ;;  %v77_v23 = vrot.slane %v203_v21, 4 }
  0x3a   :  { %v120_v24 = vrot.slane %v205_v22, 4 }
  0x3b   :  { %v78_v25 = vadd.f32 %v203_v21, %v77_v23 }
  0x3c   :  { %v121_v27 = vadd.f32 %v205_v22, %v120_v24 }
  0x3d   :  { %v79_v28 = vrot.slane %v78_v25, 2 }
  0x3e   :  { %v122_v30 = vrot.slane %v121_v27, 2 }
  0x3f   :  { %v80_v31 = vadd.f32 %v79_v28, %v78_v25 }
  0x40   :  { %v123_v34 = vadd.f32 %v122_v30, %v121_v27 }
  0x41   :  { %v81_v35 = vrot.slane %v80_v31, 1 }
  0x42   :  { %v124_v36 = vrot.slane %v123_v34, 1 }
  0x43   :  { %v82_v37 = vadd.f32 %v81_v35, %v80_v31 }
  0x44   :  { %v125_v39 = vadd.f32 %v124_v36, %v123_v34 }
  0x45   :  { %206 = vlog2.f32 %v82_v37 }
  0x46   :  { %208 = vlog2.f32 %v125_v39 }
  0x52   :  { %v207_v48 = vpop.eup %206 }
  0x53   :  { %v209_v49 = vpop.eup %208  ;;  %v84_v50 = vmul.f32 0.6931472, %v207_v48 }
  0x54   :  { %v127_v52 = vmul.f32 0.6931472, %v209_v49 }
  0x55   :  { %v85_v54 = vadd.f32 %v84_v50, %v73_v12 }
  0x56   :  { %v128_v57 = vadd.f32 %v127_v52, %v116_v13 }
  0x57   :  { %v93_v58 = vsub.f32 %v85_v54, %v92_v51 }
  0x58   :  { %v136_v59 = vsub.f32 %v128_v57, %v135_v53 }
  0x59   :  { %v94_v60 = vmul.f32 %v189_v56, %v93_v58 }
  0x5a   :  { %v137_v61 = vmul.f32 %v189_v56, %v136_v59 }
  0x5b   :  { %v96_v62 = vsel %vm95_vm2, %v94_v60, 0.0 }
  0x5c   :  { %97 = vadd.xlane.f32.xlu0 %v96_v62  ;;  %v138_v63 = vsel %vm95_vm2, %v137_v61, 0.0 }
  0x60   :  { %139 = vadd.xlane.f32.xlu0 %v138_v63 }
  0xe5   :  { %v98_v0 = vpop.xlane.xlu0 %97 }
  0xe6   :  { %v99_v1 = vrot.slane %v98_v0, 4 }
  0xe8   :  { %v100_v2 = vadd.f32 %v99_v1, %v98_v0 }
  0xe9   :  { %v140_v3 = vpop.xlane.xlu0 %139 }
  0xea   :  { %v101_v4 = vrot.slane %v100_v2, 2  ;;  %v141_v5 = vrot.slane %v140_v3, 4 }
  0xec   :  { %v142_v6 = vadd.f32 %v141_v5, %v140_v3  ;;  %v102_v7 = vadd.f32 %v101_v4, %v100_v2 }
  0xee   :  { %v143_v8 = vrot.slane %v142_v6, 2  ;;  %v103_v9 = vrot.slane %v102_v7, 1 }
  0xf0   :  { %v144_v10 = vadd.f32 %v143_v8, %v142_v6  ;;  %v104_v11 = vadd.f32 %v103_v9, %v102_v7 }
  0xf2   :  { %193 = vpush %v104_v11  ;;  %v145_v12 = vrot.slane %v144_v10, 1 }
  0xf4   :  { %v146_v13 = vadd.f32 %v145_v12, %v144_v10 }
  0xf6   :  { %195 = vpush %v146_v13 }
 0x123   :  { %s194_s2 = spop %193 }
 0x124   :  { %s155_s25 = smul.f32 0.125, %s194_s2 }
 0x126   :  { %157 = sst [smem:[#allocation8]] %s155_s25 }
 0x127   :  { %s196_s26 = spop %195 }
 0x128   :  { %s159_s27 = smul.f32 0.125, %s196_s26 }
 0x129   :  { %169 = dma.smem_to_hbm %s277_s28, 16, %s322_s3, [#allocation5]  }
 0x12a   :  { %161 = sst [smem:[#allocation9]] %s159_s27 }
 0x12b   :  { %177 = dma.smem_to_hbm %s278_s5, 16, %s323_s4, [#allocation10]  }
 0x12c   :  { %270 = dma.done.wait [#allocation5], 16  }
 0x12d   :  { %271 = vsyncadd [#allocation5], 4294967280 }
 0x12e   :  { %272 = dma.done.wait [#allocation10], 16  }
 0x12f   :  { %273 = vsyncadd [#allocation10], 4294967280 }
 0x130   :  { %184 = sfence }
 0x131   :  { %185 = vsyncpa [#allocation4], 1 }
 0x132   :  { %186 = vsyncpa [#allocation7], 1 }
 0x133   :  { %187 = vsyncpa [#allocation5], 1 }
 0x134   :  { %188 = vsyncpa [#allocation10], 1 }

</bundles_post_ra>
